<compile_context>
chip_gen: v7x
topology: tpu7x:2x2x1
jax: 0.10.0
libtpu: 0.0.40
codegen_flags: <defaults>
</compile_context>

<pallas_src>
import functools

import jax
import jax.numpy as jnp
from jax import lax
from jax.experimental import pallas as pl
from jax.experimental.pallas import tpu as pltpu


_VMEM_LIMIT = 32 * 1024 * 1024   # explicit scoped-VMEM budget (usage is ~2 MB)


# ---------------------------------------------------------------------------
# Kernel 1: tiled matmul (fused QKV projection and O projection), bf16 MXU path
# ---------------------------------------------------------------------------
def _matmul_kernel(a_ref, b_ref, o_ref):
    # K fits in one block: no accumulator scratch / init / finalize needed.
    o_ref[...] = jnp.dot(a_ref[...].astype(jnp.bfloat16),
                         b_ref[...].astype(jnp.bfloat16),
                         preferred_element_type=jnp.float32).astype(o_ref.dtype)


def _matmul_kernel_ksplit(a_ref, b_ref, o_ref, acc_ref):
    @pl.when(pl.program_id(2) == 0)
    def _():
        acc_ref[...] = jnp.zeros_like(acc_ref)

    acc_ref[...] += jnp.dot(a_ref[...].astype(jnp.bfloat16),
                            b_ref[...].astype(jnp.bfloat16),
                            preferred_element_type=jnp.float32)

    @pl.when(pl.program_id(2) == pl.num_programs(2) - 1)
    def _():
        o_ref[...] = acc_ref[...].astype(o_ref.dtype)


def matmul(a, b, *, out_dtype=None, tm=256, tn=256, tk=512):
    """C = A @ B with bf16 MXU operands and f32 accumulation."""
    M, K = a.shape
    K2, N = b.shape
    assert K == K2
    out_dtype = a.dtype if out_dtype is None else out_dtype
    tm, tn, tk = min(tm, M), min(tn, N), min(tk, K)
    assert M % tm == 0 and N % tn == 0 and K % tk == 0
    nk = K // tk
    cost = pl.CostEstimate(
        flops=2 * M * N * K,
        transcendentals=0,
        bytes_accessed=int(M * K * a.dtype.itemsize * (N // tn)
                           + K * N * b.dtype.itemsize * (M // tm)
                           + M * N * jnp.dtype(out_dtype).itemsize))
    if nk == 1:
        return pl.pallas_call(
            _matmul_kernel,
            out_shape=jax.ShapeDtypeStruct((M, N), out_dtype),
            grid=(M // tm, N // tn),
            in_specs=[pl.BlockSpec((tm, K), lambda i, j: (i, 0)),
                      pl.BlockSpec((K, tn), lambda i, j: (0, j))],
            out_specs=pl.BlockSpec((tm, tn), lambda i, j: (i, j)),
            compiler_params=pltpu.CompilerParams(
                dimension_semantics=("parallel", "parallel"),
                vmem_limit_bytes=_VMEM_LIMIT),
            cost_estimate=cost,
        )(a, b)
    return pl.pallas_call(
        _matmul_kernel_ksplit,
        out_shape=jax.ShapeDtypeStruct((M, N), out_dtype),
        grid=(M // tm, N // tn, nk),
        in_specs=[pl.BlockSpec((tm, tk), lambda i, j, k: (i, k)),
                  pl.BlockSpec((tk, tn), lambda i, j, k: (k, j))],
        out_specs=pl.BlockSpec((tm, tn), lambda i, j, k: (i, j)),
        scratch_shapes=[pltpu.VMEM((tm, tn), jnp.float32)],
        compiler_params=pltpu.CompilerParams(
            dimension_semantics=("parallel", "parallel", "arbitrary"),
            vmem_limit_bytes=_VMEM_LIMIT),
        cost_estimate=cost,
    )(a, b)


# ---------------------------------------------------------------------------
# Kernel 2: fused, lane-dense rotary tables  ->  cos_full, sin_signed  [S, D]
#   cos_full   = [cos | cos]
#   sin_signed = [-sin | sin]   (sign baked in so applying RoPE is 2 FMAs + roll)
# ---------------------------------------------------------------------------
def rotary_tables_kernel(inv_freq_ref, cos_ref, sin_ref):
    ts, d = cos_ref.shape
    half = d // 2
    row = (pl.program_id(0) * ts
           + lax.broadcasted_iota(jnp.int32, (ts, d), 0)).astype(jnp.float32)
    freqs = row * inv_freq_ref[...]            # inv_freq duplicated across halves
    col = lax.broadcasted_iota(jnp.int32, (ts, d), 1)
    sign = jnp.where(col < half, -1.0, 1.0)
    cos_ref[...] = jnp.cos(freqs).astype(cos_ref.dtype)
    sin_ref[...] = (sign * jnp.sin(freqs)).astype(sin_ref.dtype)


def rotary_tables(seq_len, inv_freq, *, dtype=jnp.float32, ts=256):
    half = inv_freq.shape[0]
    d = 2 * half
    ts = min(ts, seq_len)
    assert seq_len % ts == 0
    inv_freq_full = jnp.concatenate([inv_freq, inv_freq]).reshape(1, d)
    inv_freq_full = inv_freq_full.astype(jnp.float32)
    return pl.pallas_call(
        rotary_tables_kernel,
        out_shape=(jax.ShapeDtypeStruct((seq_len, d), dtype),
                   jax.ShapeDtypeStruct((seq_len, d), dtype)),
        grid=(seq_len // ts,),
        in_specs=[pl.BlockSpec((1, d), lambda s: (0, 0))],
        out_specs=(pl.BlockSpec((ts, d), lambda s: (s, 0)),
                   pl.BlockSpec((ts, d), lambda s: (s, 0))),
        compiler_params=pltpu.CompilerParams(
            dimension_semantics=("parallel",),
            vmem_limit_bytes=_VMEM_LIMIT),
        cost_estimate=pl.CostEstimate(
            flops=2 * seq_len * d,
            transcendentals=2 * seq_len * d,
            bytes_accessed=4 * (2 * seq_len * d + d)),
    )(inv_freq_full)


# ---------------------------------------------------------------------------
# Kernel 3: causal flash attention with fused RoPE, reading Q/K/V directly
#           from the [B*S, 3*H*D] QKV buffer and writing [B*S, H*D] output.
# ---------------------------------------------------------------------------
def flash_kernel(q_ref, k_ref, v_ref, cos_q_ref, sin_q_ref, cos_k_ref, sin_k_ref,
                 o_ref, qrot_sc, m_sc, l_sc, acc_sc, *, scale):
    qi = pl.program_id(1)
    ki = pl.program_id(2)
    half = q_ref.shape[-1] // 2

    @pl.when(ki == 0)
    def _():
        # Rotate + pre-scale the Q tile once per (batch*head, q-tile); cache bf16.
        q = q_ref[...].astype(jnp.float32)
        q_rot = q * cos_q_ref[...] + pltpu.roll(q, shift=half, axis=1) * sin_q_ref[...]
        qrot_sc[...] = (q_rot * scale).astype(qrot_sc.dtype)
        m_sc[...] = jnp.full(m_sc.shape, -jnp.inf, m_sc.dtype)
        l_sc[...] = jnp.zeros(l_sc.shape, l_sc.dtype)
        acc_sc[...] = jnp.zeros(acc_sc.shape, acc_sc.dtype)

    def scores():
        k = k_ref[...].astype(jnp.float32)
        k_rot = (k * cos_k_ref[...] +
                 pltpu.roll(k, shift=half, axis=1) * sin_k_ref[...]).astype(jnp.bfloat16)
        return lax.dot_general(qrot_sc[...], k_rot, (((1,), (1,)), ((), ())),
                               preferred_element_type=jnp.float32)

    def online_update(s):
        m_prev = m_sc[...]                                     # (tq, D) lane-broadcast
        row_max = jnp.max(s, axis=-1, keepdims=True)           # (tq, 1)
        m_new = jnp.maximum(m_prev, row_max)                   # stays lane-uniform
        m_new_col = jnp.maximum(jnp.max(m_prev, axis=-1, keepdims=True), row_max)
        alpha = jnp.exp(m_prev - m_new)
        p = jnp.exp(s - m_new_col)                             # (tq, tk)
        l_sc[...] = alpha * l_sc[...] + jnp.sum(p, axis=-1, keepdims=True)
        acc_sc[...] = alpha * acc_sc[...] + jnp.dot(
            p.astype(v_ref.dtype), v_ref[...], preferred_element_type=jnp.float32)
        m_sc[...] = m_new

    @pl.when(ki < qi)      # strictly below the diagonal: no mask needed
    def _():
        online_update(scores())

    @pl.when(ki == qi)     # diagonal tile: mask, update, and finalize here
    def _():
        s = scores()
        # tq == tk, so on the diagonal tile the global causal condition reduces
        # to a local row >= col comparison.
        row = lax.broadcasted_iota(jnp.int32, s.shape, 0)
        col = lax.broadcasted_iota(jnp.int32, s.shape, 1)
        online_update(jnp.where(row >= col, s, -1e30))
        o_ref[...] = (acc_sc[...] *
                      pl.reciprocal(l_sc[...], approx=True)).astype(o_ref.dtype)


def flash_attention(qkv, cos_full, sin_signed, *, batch, seq, num_heads, head_dim,
                    tq=256, tk=256):
    B, S, H, D = batch, seq, num_heads, head_dim
    Hd = H * D
    assert qkv.shape == (B * S, 3 * Hd)
    assert D % 128 == 0, "head_dim must be lane-dense (multiple of 128)"
    tq, tk = min(tq, S), min(tk, S)
    assert tq == tk, "diagonal-tile masking assumes square tiles"
    assert S % tq == 0
    n_q = S // tq
    n_k = S // tk
    scale = 1.0 / (D ** 0.5)

    # Q/K/V live side by side in the QKV buffer: column block (width D) picks
    # projection + head; row block (height tq) picks (batch, seq-tile).
    def q_map(bh, qi, ki):
        return ((bh // H) * n_q + qi, bh % H)

    def k_map(bh, qi, ki):   # clamp above-diagonal steps -> DMA skipped
        return ((bh // H) * n_k + jnp.minimum(ki, qi), H + bh % H)

    def v_map(bh, qi, ki):
        return ((bh // H) * n_k + jnp.minimum(ki, qi), 2 * H + bh % H)

    def rope_q_map(bh, qi, ki):
        return (qi, 0)

    def rope_k_map(bh, qi, ki):
        return (jnp.minimum(ki, qi), 0)

    def o_map(bh, qi, ki):
        return ((bh // H) * n_q + qi, bh % H)

    causal = (n_k + 1) / (2.0 * n_k)   # fraction of score tiles actually computed
    cost = pl.CostEstimate(
        flops=int(4 * B * H * S * S * D * causal),
        transcendentals=int(B * H * S * S * causal),
        bytes_accessed=int(2 * B * S * Hd * 2                        # Q read + O write (bf16)
                           + 2 * B * H * n_q * causal * S * D * 2    # K/V re-streamed (clamped)
                           + 2 * B * H * n_q * (1 + n_q * causal) * tq * D * 4))  # rope tables

    kernel = functools.partial(flash_kernel, scale=scale)
    return pl.pallas_call(
        kernel,
        out_shape=jax.ShapeDtypeStruct((B * S, Hd), jnp.bfloat16),
        grid=(B * H, n_q, n_k),
        in_specs=[
            pl.BlockSpec((tq, D), q_map),
            pl.BlockSpec((tk, D), k_map),
            pl.BlockSpec((tk, D), v_map),
            pl.BlockSpec((tq, D), rope_q_map),
            pl.BlockSpec((tq, D), rope_q_map),
            pl.BlockSpec((tk, D), rope_k_map),
            pl.BlockSpec((tk, D), rope_k_map),
        ],
        out_specs=pl.BlockSpec((tq, D), o_map),
        scratch_shapes=[
            pltpu.VMEM((tq, D), jnp.bfloat16),   # rotated + pre-scaled Q tile
            pltpu.VMEM((tq, D), jnp.float32),    # running max (lane-broadcast)
            pltpu.VMEM((tq, D), jnp.float32),    # running denominator (lane-broadcast)
            pltpu.VMEM((tq, D), jnp.float32),    # output accumulator
        ],
        compiler_params=pltpu.CompilerParams(
            dimension_semantics=("parallel", "parallel", "arbitrary"),
            vmem_limit_bytes=_VMEM_LIMIT),
        cost_estimate=cost,
    )(qkv, qkv, qkv, cos_full, sin_signed, cos_full, sin_signed)


# ---------------------------------------------------------------------------
# Module-equivalent wrapper
# ---------------------------------------------------------------------------
class LlamaSdpaAttentionPallas:
    def __init__(self, hidden_size, num_heads, key, base=10000.0):
        self.hidden_size = hidden_size
        self.num_heads = num_heads
        self.head_dim = hidden_size // num_heads
        kq, kk, kv, ko = jax.random.split(key, 4)
        scale = hidden_size ** -0.5
        # f32 master weights ([in, out] layout; PyTorch Linear computes x @ W.T, same math).
        self.wq = jax.random.normal(kq, (hidden_size, hidden_size), jnp.float32) * scale
        self.wk = jax.random.normal(kk, (hidden_size, hidden_size), jnp.float32) * scale
        self.wv = jax.random.normal(kv, (hidden_size, hidden_size), jnp.float32) * scale
        self.wo = jax.random.normal(ko, (hidden_size, hidden_size), jnp.float32) * scale
        self.inv_freq = 1.0 / (base ** (jnp.arange(0, self.head_dim, 2,
                                                   dtype=jnp.float32) / self.head_dim))
        # bf16 copies fed to the MXU; fused QKV weight concatenated once here.
        self.w_qkv_bf16 = jnp.concatenate([self.wq, self.wk, self.wv],
                                          axis=1).astype(jnp.bfloat16)
        self.wo_bf16 = self.wo.astype(jnp.bfloat16)
        self._rope_cache = {}

    def _rope_tables(self, seq_len):
        if seq_len not in self._rope_cache:
            self._rope_cache[seq_len] = rotary_tables(seq_len, self.inv_freq)
        return self._rope_cache[seq_len]

    def __call__(self, x, attention_mask=None):
        # TODO(synk): dense attention_mask tensors are not supported; only causal
        #             masking is implemented (matches attn_mask=None, is_causal=True).
        B, S, Hd = x.shape
        H, D = self.num_heads, self.head_dim
        x2d = x.reshape(B * S, Hd)

        # Fused QKV projection: single bf16 MXU pass over x, bf16 activations out.
        qkv = matmul(x2d, self.w_qkv_bf16, out_dtype=jnp.bfloat16)   # [B*S, 3*Hd]

        # Cached full-width rotary tables [S, D] (f32).
        cos_full, sin_signed = self._rope_tables(S)

        # Fused RoPE + causal flash attention; output comes back in [B*S, Hd].
        o2d = flash_attention(qkv, cos_full, sin_signed,
                              batch=B, seq=S, num_heads=H, head_dim=D)

        # Output projection (bf16 MXU inputs, f32 result).
        out = matmul(o2d, self.wo_bf16, out_dtype=jnp.float32)
        return out.reshape(B, S, Hd)


# ---------------------------------------------------------------------------
# Pure-JAX reference (mirrors the PyTorch module semantics, all f32)
# ---------------------------------------------------------------------------
def reference_forward(x, wq, wk, wv, wo, inv_freq, num_heads):
    B, S, Hd = x.shape
    H = num_heads
    D = Hd // H
    q = (x @ wq).reshape(B, S, H, D)
    k = (x @ wk).reshape(B, S, H, D)
    v = (x @ wv).reshape(B, S, H, D)
    t = jnp.arange(S, dtype=jnp.float32)
    sinusoid = jnp.einsum("i,j->ij", t, inv_freq)
    sin = jnp.sin(sinusoid)[None, :, None, :]
    cos = jnp.cos(sinusoid)[None, :, None, :]

    def rope(z):
        z1, z2 = z[..., : D // 2], z[..., D // 2:]
        return jnp.concatenate([z1 * cos - z2 * sin, z2 * cos + z1 * sin], axis=-1)

    q, k = rope(q), rope(k)
    q, k, v = (z.transpose(0, 2, 1, 3) for z in (q, k, v))
    s = jnp.einsum("bhqd,bhkd->bhqk", q, k) / jnp.sqrt(jnp.float32(D))
    mask = jnp.tril(jnp.ones((S, S), dtype=bool))
    s = jnp.where(mask[None, None], s, -jnp.inf)
    p = jax.nn.softmax(s, axis=-1)
    o = jnp.einsum("bhqk,bhkd->bhqd", p, v)
    o = o.transpose(0, 2, 1, 3).reshape(B, S, Hd)
    return o @ wo


if __name__ == "__main__":
    # Small but tiling-friendly Llama-like shapes: head_dim = 128 (lane-dense).
    batch, seq_len, num_heads, head_dim = 2, 256, 2, 128
    hidden_size = num_heads * head_dim          # 256

    key = jax.random.PRNGKey(0)
    k_x, k_w = jax.random.split(key)
    attn = LlamaSdpaAttentionPallas(hidden_size, num_heads, k_w)
    x = jax.random.normal(k_x, (batch, seq_len, hidden_size), jnp.float32)

    out = jax.block_until_ready(attn(x))

    ref = jax.block_until_ready(
        reference_forward(x, attn.wq, attn.wk, attn.wv, attn.wo,
                          attn.inv_freq, num_heads))

    assert out.shape == (batch, seq_len, hidden_size)
    # Tolerance reflects bf16 MXU inputs (f32 accumulation) vs. an all-f32 reference.
    max_err = float(jnp.max(jnp.abs(out - ref)))
    assert jnp.allclose(out, ref, atol=5e-2, rtol=5e-2), max_err

    print("KERNEL_OK")
</pallas_src>

<mosaic_0001>
module attributes {stable_mosaic.version = 11 : i64} {
  func.func @_matmul_kernel(%arg0: i32, %arg1: i32, %arg2: memref<256x256xf32, #tpu.memory_space<vmem>>, %arg3: memref<256x256xbf16, #tpu.memory_space<vmem>>, %arg4: memref<256x256xbf16, #tpu.memory_space<vmem>>) attributes {dimension_semantics = [#tpu.dimension_semantics<parallel>, #tpu.dimension_semantics<parallel>], iteration_bounds = array<i64: 2, 3>, scalar_prefetch = 0 : i64, scratch_operands = 0 : i64, tpu.core_type = #tpu.core_type<tc>, window_params = [{transform_indices = @transform_0, window_bounds = array<i64: 256, 256>}, {transform_indices = @transform_1, window_bounds = array<i64: 256, 256>}, {transform_indices = @transform_2, window_bounds = array<i64: 256, 256>}]} {
    %c0 = arith.constant 0 : index
    %c0_0 = arith.constant 0 : index
    %0 = vector.load %arg2[%c0, %c0_0] : memref<256x256xf32, #tpu.memory_space<vmem>>, vector<256x256xf32>
    %1 = arith.truncf %0 : vector<256x256xf32> to vector<256x256xbf16>
    %c0_1 = arith.constant 0 : index
    %c0_2 = arith.constant 0 : index
    %2 = vector.load %arg3[%c0_1, %c0_2] : memref<256x256xbf16, #tpu.memory_space<vmem>>, vector<256x256xbf16>
    %cst = arith.constant dense<0.000000e+00> : vector<256x256xf32>
    %3 = tpu.matmul %1, %2, %cst {dimension_numbers = #tpu.dot_dimension_numbers<[1], [0], [0], [1], [0, 0, 1, 1], [], []>} : vector<256x256xbf16>, vector<256x256xbf16>, vector<256x256xf32> -> vector<256x256xf32>
    %4 = arith.truncf %3 : vector<256x256xf32> to vector<256x256xbf16>
    %c0_3 = arith.constant 0 : index
    %c0_4 = arith.constant 0 : index
    %5 = vector.load %arg4[%c0_3, %c0_4] : memref<256x256xbf16, #tpu.memory_space<vmem>>, vector<256x256xbf16>
    tpu.vector_store %arg4[%c0_3, %c0_4], %4 {strides = array<i32>} : memref<256x256xbf16, #tpu.memory_space<vmem>>, vector<256x256xbf16>,
    return
  }
  func.func @transform_0(%arg0: i32, %arg1: i32) -> (i32, i32) {
    %c0_i32 = arith.constant 0 : i32
    %c0_i32_0 = arith.constant 0 : i32
    return %arg0, %c0_i32 : i32, i32
  }
  func.func @transform_1(%arg0: i32, %arg1: i32) -> (i32, i32) {
    %c0_i32 = arith.constant 0 : i32
    %c0_i32_0 = arith.constant 0 : i32
    return %c0_i32, %arg1 : i32, i32
  }
  func.func @transform_2(%arg0: i32, %arg1: i32) -> (i32, i32) {
    %c0_i32 = arith.constant 0 : i32
    return %arg0, %arg1 : i32, i32
  }
}

</mosaic_0001>

<bundles_post_ra>
// kernel: tpu_custom_call.1
= control target key start
LH: loop header
LB: loop body
LE: loop exit
PB: predicated region body
PF: predicated region fallthrough
CT: control target
= control target key end

     0   :  { %s2111_s0 = inlined_call_operand.hbm [shape: f32[512,256], index: 0, kind: input, shape index: {}]   ;;  %s2112_s1 = inlined_call_operand.hbm [shape: bf16[256,768], index: 1, kind: input, shape index: {}]   ;;  %s2113_s2 = inlined_call_operand.hbm [shape: bf16[512,768], index: 2, kind: output, shape index: {}]  }
   0x1   :  { %2125 = sst [smem:[#allocation17_spill]] %s2111_s0 }
   0x2   :  { %2126 = sst [smem:[#allocation18_spill]] %s2113_s2 }
   0x3   :  { %7 = vsyncpa [#allocation3], 0 }
   0x4   :  { %9 = vsyncpa [#allocation3 + $0x1], 0 }
   0x5   :  { %10 = vsyncpa [#allocation6], 0 }
   0x6   :  { %12 = vsyncpa [#allocation6 + $0x1], 0 }
   0x7   :  { %13 = vsyncpa [#allocation4], 0 }
   0x8   :  { %15 = vsyncpa [#allocation4 + $0x1], 0  ;;  %s1632_s9 = smov 0   ;;  %s1634_s10 = smov 0  }
   0x9   :  { %s1636_s11 = smov 0   ;;  %s1638_s12 = smov 0  }
   0xa   :  { %s1640_s13 = smov 0   ;;  %s1642_s14 = smov 0  }
   0xb   :  { %s1644_s15 = smov 0   ;;  %s1646_s16 = smov 0  }
   0xc   :  { %s1648_s17 = smov 0   ;;  %s1650_s18 = smov 0  }
   0xd   :  { %s1652_s19 = smov 0   ;;  %s1654_s20 = smov 0  }
   0xe   :  { %s1656_s21 = smov 0   ;;  %s1658_s22 = smov 0  }
   0xf LB: > { %2127 = sst [smem:[#allocation11_spill]] %s1588_s18  ;;  %s1053_s23 = sadd.s32 4294967295, %s1604_s22   ;;  %s1604_s22 = sphi %s1658_s22, %s21_s22   ;;  %s1600_s21 = sphi %s1656_s21, %s2159_s21   ;;  %s1596_s20 = sphi %s1654_s20, %s2170_s20   ;;  %s1592_s19 = sphi %s1652_s19, %s2157_s19   ;;  %s1588_s18 = sphi %s1650_s18, %s2169_s18   ;;  %s1584_s17 = sphi %s1648_s17, %s2168_s17   ;;  %s1580_s16 = sphi %s1646_s16, %s2167_s16   ;;  %s1576_s15 = sphi %s1644_s15, %s2166_s15   ;;  %s1572_s14 = sphi %s1642_s14, %s2165_s14   ;;  %s1568_s13 = sphi %s1640_s13, %s2164_s13   ;;  %s1564_s12 = sphi %s1638_s12, %s2163_s12   ;;  %s1560_s11 = sphi %s1636_s11, %s2162_s11   ;;  %s1556_s10 = sphi %s1634_s10, %s2161_s10   ;;  %s1552_s9 = sphi %s1632_s9, %s2160_s9  }
  0x10   : > { %2128 = sst [smem:[#allocation12_spill]] %s1600_s21  ;;  %s33_s24 = sadd.s32 1, %s1600_s21 }
  0x11   : > { %p47_p0 = scmp.ne.s32.totalorder %s1584_s17, %s1580_s16  ;;  %p2115_p1 = scmp.eq.s32.totalorder %s1604_s22, 0 }
  0x12   : > { %p53_p2 = scmp.ne.s32.totalorder %s1580_s16, %s1576_s15  ;;  %p1707_p3 = scmp.eq.s32.totalorder %s1053_s23, 0 }
  0x13   : > { %p1711_p4 = scmp.eq.s32.totalorder %s1053_s23, 5  ;;  %p49_p5 = por %p2115_p1, %p47_p0 }
  0x14   : > { %p1719_p6 = por %p1707_p3, %p53_p2  ;;  %p2114_p7 = scmp.lt.s32.totalorder %s1604_s22, 6 }
  0x15   : > { %s2130_s27 = scalar_select %p1711_p4, 1, 0 }
  0x16   : > { %s2131_s28 = scalar_select %p1719_p6, 1, 0 }
  0x17   : > { %s131_s29 = sand.u32 1, %s1584_s17   ;;  %s1140_s30 = sshll.u32 %s1600_s21, 13 }
  0x18   : > { %s1057_s3 = sshll.u32 %s131_s29, 9  ;;  %s2132_s0 = sld [smem:[#allocation17_spill]] }
  0x19   : > { %s135_s7 = scalar_lea.vmem [#allocation2], %s1057_s3  ;;  %p1733_p8 = pnand %p2114_p7, %p49_p5 }
  0x1a   : > { %s143_s8 = sshll.u32 %s135_s7, 4  ;;  %s1739_s23 = scalar_lea.sflag [#allocation3], %s131_s29  ;;  %s1737_s8 = int_to_ptr.vmem [resolvable:$true] %s143_s8 }
  0x1b   : > { %p1396_p10 = pneg %p1733_p8 }
  0x1e   : > { %s1729_s6 = scalar_lea.hbm %s2132_s0, %s1140_s30  ;;  %s1399_s5 = scalar_lea.hbm %s2132_s0, 16384 }
  0x1f   : > { %s1394_s4 = scalar_lea.hbm %s1729_s6, 8192  ;;  %p1400_p13 = scmp.lt.u32.totalorder %s1729_s6, %s2132_s0 }
  0x20   : > { %p1395_p9 = scmp.ne.s32.totalorder %s1729_s6, %s1394_s4  ;;  %p1401_p0 = scmp.lt.u32.totalorder %s1399_s5, %s1394_s4 }
  0x21   : > { %p1403_p5 = scmp.lt.u32.totalorder %s1394_s4, %s1729_s6 }
  0x22   : > { %p1397_p11 = pnand %p1396_p10, %p1395_p9  ;;  %p1402_p2 = por %p1401_p0, %p1400_p13 }
  0x24   : > { %p1398_p12 = pneg %p1397_p11  ;;  %p1404_p7 = por %p1403_p5, %p1402_p2 }
  0x26   : > { %p1405_p1 = pnand %p1404_p7, %p1398_p12 }
  0x28   : > { %1408 = shalt.err (!%p1405_p1)
}
  0x29   : > { %s1409_s29 = scalar_lea.vmem %s1737_s8, 8192  ;;  %s1606_s30 = smov [#allocation2]  }
  0x2a   : > { %p1410_p9 = scmp.ne.s32.totalorder %s1737_s8, %s1409_s29  ;;  %s1414_s3 = sshll.u32 %s1606_s30, 4  ;;  %s1415_s3 = int_to_ptr.vmem [resolvable:$false] %s1414_s3 }
  0x2b   : > { %s1416_s25 = scalar_lea.vmem %s1415_s3, 16384  ;;  %p1417_p4 = scmp.lt.s32.totalorder %s1737_s8, %s1415_s3 }
  0x2c   : > { %p1412_p11 = pnand %p1410_p9, %p1396_p10  ;;  %p1418_p13 = scmp.lt.s32.totalorder %s1416_s25, %s1409_s29 }
  0x2e   : > { %p1413_p6 = pneg %p1412_p11  ;;  %p1419_p0 = por %p1418_p13, %p1417_p4 }
  0x30   : > { %p1420_p2 = pnand %p1419_p0, %p1413_p6 }
  0x32   : > { %1423 = shalt.err (!%p1420_p2)
}
  0x33   : > { %s1607_s4 = smov 256   ;;  %s1608_s5 = smov 16  }
  0x34   : > { %1216 = dma.hbm_to_vmem [thread:$0]  (!%p1733_p8), %s1729_s6, 8192, %s1737_s8, %s1739_s23, %s1607_s4, %s1607_s4, %s1608_s5  }
  0x35   : > { %p1064_p1 = scmp.ge.s32.totalorder %s1604_s22, 1  ;;  %p172_p4 = scmp.lt.s32.totalorder %s1604_s22, 7 }
  0x36   : > { %s1054_s29 = sadd.s32 4294967294, %s1604_s22   ;;  %s30_s30 = sadd.s32 1, %s1596_s20 }
  0x37   : > { %p1769_p6 = pnand %p1064_p1, %p172_p4  ;;  %s66_s3 = sadd.s32 1, %s1572_s14 }
  0x38   : > { %p31_p7 = scmp.ge.s32.totalorder %s30_s30, 3  ;;  %p73_p10 = scmp.ne.s32.totalorder %s1572_s14, %s1568_s13 }
  0x39   : > { %p79_p12 = scmp.ne.s32.totalorder %s1568_s13, %s1564_s12  ;;  %s94_s15 = sadd.s32 1, %s1560_s11 }
  0x3a   : > { %s2172_s30 = smov (%p31_p7, %s30_s30), 0  ;;  %s2174_s24 = smov (!%p31_p7, %s33_s24), %s1600_s21 }
  0x3b   : > { %2135 = sst [smem:[#allocation13_spill]] %s2172_s30  ;;  %s63_s6 = ssub.s32 %s1596_s20, %s2172_s30 }
  0x3c   : > { %p2136_p8 = scmp.eq.s32.totalorder %s1604_s22, 0  ;;  %p35_p9 = scmp.ge.s32.totalorder %s2174_s24, 2 }
  0x3d   : > { %p64_p11 = scmp.eq.s32.totalorder %s63_s6, 0  ;;  %p1796_p13 = por %p79_p12, %p1707_p3 }
  0x3e   : > { %p1790_p5 = por %p73_p10, %p2136_p8  ;;  %p104_p0 = scmp.ne.s32.totalorder %s1560_s11, %s1556_s10 }
  0x3f   : > { %s2138_s12 = scalar_select %p1796_p13, 1, 0 }
  0x40   : > { %s2176_s24 = smov (%p35_p9, %s2174_s24), 0  ;;  %p2141_p2 = scmp.ne.s32.totalorder %s2130_s27, 0 }
  0x41   : > { %2139 = sst [smem:[#allocation14_spill]] %s2176_s24  ;;  %s37_s25 = ssub.s32 %s1600_s21, %s2176_s24 }
  0x42   : > { %s1805_s23 = scalar_select %p64_p11, %s1572_s14, %s66_s3  }
  0x43   : > { %p1811_p1 = por %p2141_p2, %p104_p0  ;;  %p38_p4 = scmp.eq.s32.totalorder %s37_s25, 0 }
  0x44   : > { %2140 = sst [smem:[#allocation15_spill]] %s1805_s23  ;;  %s91_s26 = sor.u32 %s63_s6, %s37_s25 }
  0x45   : > { %s2142_s4 = scalar_select %p1811_p1, 1, 0 }
  0x46   : > { %p92_p3 = scmp.eq.s32.totalorder %s91_s26, 0  ;;  %p110_p7 = scmp.ne.s32.totalorder %s1556_s10, %s1552_s9 }
  0x47   : > { %2143 = sst [smem:[#allocation16_spill]] %s2142_s4  ;;  %s2144_s5 = sadd.s32 1, %s1584_s17 }
  0x48   : > { %s1820_s0 = scalar_select %p38_p4, %s1584_s17, %s2144_s5  }
  0x49   : > { %s1823_s30 = scalar_select %p92_p3, %s1560_s11, %s94_s15  }
  0x4a   : > { %p111_p10 = scmp.eq.s32.totalorder %s1054_s29, 5  ;;  %s153_s3 = sand.u32 1, %s1572_s14  }
  0x4b   : > { %s1061_s23 = sshll.u32 %s153_s3, 8  ;;  %s1141_s24 = sshll.u32 %s1596_s20, 7 }
  0x4c   : > { %p1826_p12 = por %p111_p10, %p110_p7  ;;  %s157_s21 = scalar_lea.vmem [#allocation5], %s1061_s23 }
  0x4d   : > { %s164_s2 = sshll.u32 %s157_s21, 4  ;;  %s1834_s6 = scalar_lea.hbm %s2112_s1, %s1141_s24  ;;  %s1836_s2 = int_to_ptr.vmem [resolvable:$true] %s164_s2 }
  0x4e   : > { %s2145_s27 = scalar_select %p1826_p12, 1, 0 }
  0x4f   : > { %p2146_p8 = scmp.lt.s32.totalorder %s1604_s22, 6  ;;  %s1846_s21 = scalar_lea.sflag [#allocation6], %s153_s3 }
  0x50   : > { %s1424_s15 = scalar_lea.hbm %s1834_s6, 4096  ;;  %s1429_s8 = scalar_lea.hbm %s2112_s1, 12288 }
  0x51   : > { %p1842_p9 = pnand %p2146_p8, %p1790_p5  ;;  %p1425_p11 = scmp.ne.s32.totalorder %s1834_s6, %s1424_s15 }
  0x52   : > { %p1430_p5 = scmp.lt.u32.totalorder %s1834_s6, %s2112_s1  ;;  %p1431_p3 = scmp.lt.u32.totalorder %s1429_s8, %s1424_s15 }
  0x53   : > { %p1426_p0 = pneg %p1842_p9  ;;  %p1433_p10 = scmp.lt.u32.totalorder %s1424_s15, %s1834_s6 }
  0x54   : > { %p1432_p7 = por %p1431_p3, %p1430_p5 }
  0x55   : > { %p1427_p2 = pnand %p1426_p0, %p1425_p11 }
  0x56   : > { %p1434_p8 = por %p1433_p10, %p1432_p7 }
  0x57   : > { %p1428_p4 = pneg %p1427_p2 }
  0x59   : > { %p1435_p12 = pnand %p1434_p8, %p1428_p4 }
  0x5b   : > { %1438 = shalt.err (!%p1435_p12)
}
  0x5c   : > { %s1439_s4 = scalar_lea.vmem %s1836_s2, 4096  ;;  %s1609_s26 = smov [#allocation5]  }
  0x5d   : > { %p1440_p11 = scmp.ne.s32.totalorder %s1836_s2, %s1439_s4  ;;  %s1444_s5 = sshll.u32 %s1609_s26, 4  ;;  %s1445_s5 = int_to_ptr.vmem [resolvable:$false] %s1444_s5 }
  0x5e   : > { %s1446_s3 = scalar_lea.vmem %s1445_s5, 8192  ;;  %p1447_p13 = scmp.lt.s32.totalorder %s1836_s2, %s1445_s5 }
  0x5f   : > { %p1442_p2 = pnand %p1440_p11, %p1426_p0  ;;  %p1448_p5 = scmp.lt.s32.totalorder %s1446_s3, %s1439_s4 }
  0x61   : > { %p1443_p1 = pneg %p1442_p2  ;;  %p1449_p3 = por %p1448_p5, %p1447_p13 }
  0x63   : > { %p1450_p7 = pnand %p1449_p3, %p1443_p1 }
  0x65   : > { %1453 = shalt.err (!%p1450_p7)
}
  0x66   : > { %s1610_s15 = smov 384   ;;  %s1611_s18 = smov 128  }
  0x67   : > { %s1612_s24 = smov 8   ;;  %176 = sbr.rel (%p1769_p6) target bundleno = 469 (0x1d5), region = 28 }
  0x68   : > { %1219 = dma.hbm_to_vmem [thread:$0]  (!%p1842_p9), %s1834_s6, 4096, %s1836_s2, %s1846_s21, %s1610_s15, %s1611_s18, %s1612_s24  }
  0x69   : > { %s178_s8 = sand.u32 (!%p1769_p6), 1, %s1580_s16   ;;  %p2148_p13 = scmp.ne.s32.totalorder (!%p1769_p6), %s2131_s28, 0 }
  0x6a   : > { %s1065_s23 = sshll.u32 (!%p1769_p6), %s178_s8, 9  ;;  %s179_s25 = scalar_lea.sflag (!%p1769_p6), [#allocation3], %s178_s8 }
  0x6b   : > { %s1877_s4 = scalar_lea.vmem (!%p1769_p6), [#allocation2], %s1065_s23 }
  0x6e   : > { %1539 = dma.done.wait (%p2148_p13), %s179_s25, 8192  }
  0x6f   : > { %1541 = vsyncadd (%p2148_p13), %s179_s25, 4294959104  ;;  %s187_s26 = sand.u32 1, %s1568_s13   ;;  %p2149_p6 = scmp.ne.s32.totalorder %s2138_s12, 0 }
  0x70   : > { %s1066_s29 = sshll.u32 %s187_s26, 8  ;;  %s188_s2 = scalar_lea.sflag [#allocation6], %s187_s26 }
  0x71   : > { %s1884_s6 = scalar_lea.vmem [#allocation5], %s1066_s29 }
  0x72   : > { %1543 = dma.done.wait (%p2149_p6), %s188_s2, 4096  }
  0x73   : > { %1545 = vsyncadd (%p2149_p6), %s188_s2, 4294963200  ;;  %v1346_v0 = vld [vmem:[%s1884_s6 + $0x4] ss:$8 sps:$4 sm:$0xff]   ;;  %v1348_v1 = vld [vmem:[%s1884_s6] ss:$8 sps:$4 sm:$0xff]   ;;  %s214_s28 = sand.u32 1, %s1556_s10  }
  0x74   : > { %509 = vmatprep.subr.bf16.mxu0 %v1346_v0  ;;  %1174 = vmatprep.subr.bf16.mxu1 %v1346_v0  ;;  %v1349_v2 = vld [vmem:[%s1884_s6 + $0x14] ss:$8 sps:$4 sm:$0xff]   ;;  %v1351_v3 = vld [vmem:[%s1884_s6 + $0x10] ss:$8 sps:$4 sm:$0xff]   ;;  %v1352_v4 = vld [vmem:[%s1884_s6 + $0x24] ss:$8 sps:$4 sm:$0xff]  }
  0x75   : > { %510 = vmatpush1.bf16.msra.mxu0 %v1348_v1  ;;  %1190 = vmatpush1.bf16.msra.mxu1 %v1348_v1  ;;  %v1354_v5 = vld [vmem:[%s1884_s6 + $0x20] ss:$8 sps:$4 sm:$0xff]   ;;  %v1355_v6 = vld [vmem:[%s1884_s6 + $0x34] ss:$8 sps:$4 sm:$0xff]   ;;  %v1357_v7 = vld [vmem:[%s1884_s6 + $0x30] ss:$8 sps:$4 sm:$0xff]  }
  0x76   : > { %511 = vmatprep.subr.bf16.mxu0 %v1349_v2  ;;  %1175 = vmatprep.subr.bf16.mxu1 %v1349_v2  ;;  %v1358_v8 = vld [vmem:[%s1884_s6 + $0x44] ss:$8 sps:$4 sm:$0xff]   ;;  %v1360_v9 = vld [vmem:[%s1884_s6 + $0x40] ss:$8 sps:$4 sm:$0xff]   ;;  %v1361_v10 = vld [vmem:[%s1884_s6 + $0x54] ss:$8 sps:$4 sm:$0xff]  }
  0x77   : > { %v1363_v11 = vld [vmem:[%s1884_s6 + $0x50] ss:$8 sps:$4 sm:$0xff]   ;;  %v1364_v12 = vld [vmem:[%s1884_s6 + $0x64] ss:$8 sps:$4 sm:$0xff]   ;;  %v1366_v18 = vld [vmem:[%s1884_s6 + $0x60] ss:$8 sps:$4 sm:$0xff]  }
  0x78   : > { %v222_v13 = vld [vmem:[%s1877_s4 + $0x8] sm:$0xff]  ;;  %v224_v14 = vld [vmem:[%s1877_s4 + $0x18] sm:$0xff]  ;;  %v221_v38 = vld [vmem:[%s1877_s4] sm:$0xff]  ;;  %s1067_s7 = sshll.u32 %s214_s28, 8  ;;  %s2150_s21 = sld [smem:[#allocation11_spill]] }
  0x79   : > { %512 = vmatpush1.bf16.msra.mxu0 %v1351_v3  ;;  %1191 = vmatpush1.bf16.msra.mxu1 %v1351_v3  ;;  %v286_v15 = vpack.c.bf16 %v224_v14, %v222_v13  ;;  %v254_v16 = vld [vmem:[%s1877_s4 + $0x108] sm:$0xff]  ;;  %v256_v17 = vld [vmem:[%s1877_s4 + $0x118] sm:$0xff]  ;;  %v223_v39 = vld [vmem:[%s1877_s4 + $0x10] sm:$0xff]  ;;  %s1989_s12 = scalar_lea.vmem [#allocation7], %s1067_s7  ;;  %s1206_s5 = smul.u32 192, %s1592_s19 }
  0x7a   : > { %513 = vmatprep.subr.bf16.mxu0 %v1352_v4  ;;  %1176 = vmatprep.subr.bf16.mxu1 %v1352_v4  ;;  %v302_v19 = vpack.c.bf16 %v256_v17, %v254_v16  ;;  %v1367_v20 = vld [vmem:[%s1884_s6 + $0x74] ss:$8 sps:$4 sm:$0xff]   ;;  %v1369_v21 = vld [vmem:[%s1884_s6 + $0x70] ss:$8 sps:$4 sm:$0xff]   ;;  %v1370_v22 = vld [vmem:[%s1884_s6 + $0x84] ss:$8 sps:$4 sm:$0xff]   ;;  %v285_v46 = vpack.c.bf16 %v223_v39, %v221_v38 }
  0x7b   : > { %541 = vmatprep.mubr.bf16.mxu0 %v286_v15  ;;  %v1372_v23 = vld [vmem:[%s1884_s6 + $0x80] ss:$8 sps:$4 sm:$0xff]   ;;  %v1373_v24 = vld [vmem:[%s1884_s6 + $0x94] ss:$8 sps:$4 sm:$0xff]   ;;  %v1375_v25 = vld [vmem:[%s1884_s6 + $0x90] ss:$8 sps:$4 sm:$0xff]  }
  0x7c   : > { %621 = vmatprep.mubr.bf16.mxu1 %v302_v19  ;;  %v1376_v26 = vld [vmem:[%s1884_s6 + $0xa4] ss:$8 sps:$4 sm:$0xff]   ;;  %v1378_v27 = vld [vmem:[%s1884_s6 + $0xa0] ss:$8 sps:$4 sm:$0xff]   ;;  %v1379_v28 = vld [vmem:[%s1884_s6 + $0xb4] ss:$8 sps:$4 sm:$0xff]  }
  0x7d   : > { %514 = vmatpush1.bf16.msra.mxu0 %v1354_v5  ;;  %1192 = vmatpush1.bf16.msra.mxu1 %v1354_v5  ;;  %v1381_v29 = vld [vmem:[%s1884_s6 + $0xb0] ss:$8 sps:$4 sm:$0xff]   ;;  %v1382_v30 = vld [vmem:[%s1884_s6 + $0xc4] ss:$8 sps:$4 sm:$0xff]   ;;  %v1384_v31 = vld [vmem:[%s1884_s6 + $0xc0] ss:$8 sps:$4 sm:$0xff]  }
  0x7e   : > { %515 = vmatprep.subr.bf16.mxu0 %v1355_v6  ;;  %1177 = vmatprep.subr.bf16.mxu1 %v1355_v6  ;;  %v1385_v32 = vld [vmem:[%s1884_s6 + $0xd4] ss:$8 sps:$4 sm:$0xff]   ;;  %v1387_v33 = vld [vmem:[%s1884_s6 + $0xd0] ss:$8 sps:$4 sm:$0xff]   ;;  %v1388_v34 = vld [vmem:[%s1884_s6 + $0xe4] ss:$8 sps:$4 sm:$0xff]  }
  0x7f   : > { %v1390_v35 = vld [vmem:[%s1884_s6 + $0xe0] ss:$8 sps:$4 sm:$0xff]   ;;  %v1391_v36 = vld [vmem:[%s1884_s6 + $0xf4] ss:$8 sps:$4 sm:$0xff]   ;;  %v1393_v37 = vld [vmem:[%s1884_s6 + $0xf0] ss:$8 sps:$4 sm:$0xff]  }
  0x80   : > { %v253_v40 = vld [vmem:[%s1877_s4 + $0x100] sm:$0xff]  ;;  %v255_v41 = vld [vmem:[%s1877_s4 + $0x110] sm:$0xff]  ;;  %v226_v42 = vld [vmem:[%s1877_s4 + $0x28] sm:$0xff]  ;;  %s1134_s3 = sshll.u32 %s2150_s21, 1  ;;  %s943_s18 = sshll.u32 %s1989_s12, 4  ;;  %s2027_s18 = int_to_ptr.vmem [resolvable:$true] %s943_s18 }
  0x81   : > { %516 = vmatpush1.bf16.msra.mxu0 %v1357_v7  ;;  %1193 = vmatpush1.bf16.msra.mxu1 %v1357_v7  ;;  %v228_v43 = vld [vmem:[%s1877_s4 + $0x38] sm:$0xff]  ;;  %v258_v44 = vld [vmem:[%s1877_s4 + $0x128] sm:$0xff]  ;;  %v301_v47 = vpack.c.bf16 %v255_v41, %v253_v40  ;;  %v225_v50 = vld [vmem:[%s1877_s4 + $0x20] sm:$0xff]  ;;  %s940_s15 = sadd.s32 %s1206_s5, %s1134_s3  ;;  %s2151_s24 = sld [smem:[#allocation16_spill]] }
  0x82   : > { %517 = vmatprep.subr.bf16.mxu0 %v1358_v8  ;;  %1178 = vmatprep.subr.bf16.mxu1 %v1358_v8  ;;  %v260_v45 = vld [vmem:[%s1877_s4 + $0x138] sm:$0xff]  ;;  %v288_v48 = vpack.c.bf16 %v228_v43, %v226_v42  ;;  %v227_v51 = vld [vmem:[%s1877_s4 + $0x30] sm:$0xff]  ;;  %v257_v52 = vld [vmem:[%s1877_s4 + $0x120] sm:$0xff]  ;;  %s1136_s19 = sshll.u32 %s940_s15, 6  ;;  %s2152_s25 = sld [smem:[#allocation18_spill]] }
  0x83   : > { %v304_v49 = vpack.c.bf16 %v260_v45, %v258_v44  ;;  %v259_v53 = vld [vmem:[%s1877_s4 + $0x130] sm:$0xff]  ;;  %v230_v54 = vld [vmem:[%s1877_s4 + $0x48] sm:$0xff]  ;;  %v232_v55 = vld [vmem:[%s1877_s4 + $0x58] sm:$0xff]  ;;  %v287_v58 = vpack.c.bf16 %v227_v51, %v225_v50  ;;  %s2035_s26 = scalar_lea.sflag [#allocation4], %s214_s28  ;;  %s1454_s29 = scalar_lea.vmem %s2027_s18, 4096 }
  0x84   : > { %v262_v56 = vld [vmem:[%s1877_s4 + $0x148] sm:$0xff]  ;;  %v264_v57 = vld [vmem:[%s1877_s4 + $0x158] sm:$0xff]  ;;  %v303_v59 = vpack.c.bf16 %v259_v53, %v257_v52  ;;  %v290_v60 = vpack.c.bf16 %v232_v55, %v230_v54  ;;  %v229_v62 = vld [vmem:[%s1877_s4 + $0x40] sm:$0xff]  ;;  %p1455_p1 = scmp.ne.s32.totalorder %s2027_s18, %s1454_s29  ;;  %s1613_s2 = smov [#allocation7]  }
  0x85   : > { %518 = vmatpush1.bf16.msra.mxu0 %v1360_v9  ;;  %1194 = vmatpush1.bf16.msra.mxu1 %v1360_v9  ;;  %v306_v61 = vpack.c.bf16 %v264_v57, %v262_v56  ;;  %v231_v63 = vld [vmem:[%s1877_s4 + $0x50] sm:$0xff]  ;;  %v261_v0 = vld [vmem:[%s1877_s4 + $0x140] sm:$0xff]  ;;  %v234_v2 = vld [vmem:[%s1877_s4 + $0x68] sm:$0xff]  ;;  %s1458_s6 = sshll.u32 %s1613_s2, 4  ;;  %s1459_s6 = int_to_ptr.vmem [resolvable:$false] %s1458_s6 }
  0x86   : > { %519 = vmatprep.subr.bf16.mxu0 %v1361_v10  ;;  %1179 = vmatprep.subr.bf16.mxu1 %v1361_v10  ;;  %v263_v1 = vld [vmem:[%s1877_s4 + $0x150] sm:$0xff]  ;;  %v236_v3 = vld [vmem:[%s1877_s4 + $0x78] sm:$0xff]  ;;  %v266_v4 = vld [vmem:[%s1877_s4 + $0x168] sm:$0xff]  ;;  %v289_v6 = vpack.c.bf16 %v231_v63, %v229_v62  ;;  %s1460_s7 = scalar_lea.vmem %s1459_s6, 8192  ;;  %p1461_p4 = scmp.lt.s32.totalorder %s2027_s18, %s1459_s6 }
  0x87   : > { %v268_v5 = vld [vmem:[%s1877_s4 + $0x178] sm:$0xff]  ;;  %v305_v7 = vpack.c.bf16 %v263_v1, %v261_v0  ;;  %v292_v8 = vpack.c.bf16 %v236_v3, %v234_v2  ;;  %v233_v10 = vld [vmem:[%s1877_s4 + $0x60] sm:$0xff]  ;;  %v267_v13 = vld [vmem:[%s1877_s4 + $0x170] sm:$0xff]  ;;  %p2153_p12 = scmp.ne.s32.totalorder %s2151_s24, 0  ;;  %p1462_p10 = scmp.lt.s32.totalorder %s1460_s7, %s1454_s29 }
  0x88   : > { %v308_v9 = vpack.c.bf16 %v268_v5, %v266_v4  ;;  %v238_v14 = vld [vmem:[%s1877_s4 + $0x88] sm:$0xff]  ;;  %v240_v15 = vld [vmem:[%s1877_s4 + $0x98] sm:$0xff] }
  0x89   : > { %520 = vmatpush1.bf16.msra.mxu0 %v1363_v11  ;;  %1195 = vmatpush1.bf16.msra.mxu1 %v1363_v11  ;;  %v235_v11 = vld [vmem:[%s1877_s4 + $0x70] sm:$0xff]  ;;  %v270_v16 = vld [vmem:[%s1877_s4 + $0x188] sm:$0xff]  ;;  %v272_v17 = vld [vmem:[%s1877_s4 + $0x198] sm:$0xff]  ;;  %p1456_p9 = pnand %p1455_p1, %p2153_p12  ;;  %p1463_p8 = por %p1462_p10, %p1461_p4 }
  0x8a   : > { %521 = vmatprep.subr.bf16.mxu0 %v1364_v12  ;;  %1180 = vmatprep.subr.bf16.mxu1 %v1364_v12  ;;  %v265_v12 = vld [vmem:[%s1877_s4 + $0x160] sm:$0xff]  ;;  %v246_v38 = vld [vmem:[%s1877_s4 + $0xc8] sm:$0xff]  ;;  %v248_v39 = vld [vmem:[%s1877_s4 + $0xd8] sm:$0xff] }
  0x8b   : > { %v307_v19 = vpack.c.bf16 %v267_v13, %v265_v12  ;;  %v278_v40 = vld [vmem:[%s1877_s4 + $0x1c8] sm:$0xff]  ;;  %v280_v41 = vld [vmem:[%s1877_s4 + $0x1d8] sm:$0xff]  ;;  %v298_v44 = vpack.c.bf16 %v248_v39, %v246_v38  ;;  %p1457_p0 = pneg %p1456_p9 }
  0x8c   : > { %v314_v45 = vpack.c.bf16 %v280_v41, %v278_v40  ;;  %v250_v50 = vld [vmem:[%s1877_s4 + $0xe8] sm:$0xff]  ;;  %v252_v51 = vld [vmem:[%s1877_s4 + $0xf8] sm:$0xff] }
  0x8d   : > { %522 = vmatpush1.bf16.msra.mxu0 %v1366_v18  ;;  %1196 = vmatpush1.bf16.msra.mxu1 %v1366_v18  ;;  %v291_v18 = vpack.c.bf16 %v235_v11, %v233_v10  ;;  %v282_v52 = vld [vmem:[%s1877_s4 + $0x1e8] sm:$0xff]  ;;  %v284_v53 = vld [vmem:[%s1877_s4 + $0x1f8] sm:$0xff]  ;;  %v300_v56 = vpack.c.bf16 %v252_v51, %v250_v50  ;;  %p1464_p11 = pnand %p1463_p8, %p1457_p0 }
  0x8e   : > { %523 = vmatprep.subr.bf16.mxu0 %v1367_v20  ;;  %1181 = vmatprep.subr.bf16.mxu1 %v1367_v20  ;;  %v294_v20 = vpack.c.bf16 %v240_v15, %v238_v14  ;;  %v316_v57 = vpack.c.bf16 %v284_v53, %v282_v52 }
  0x91   : > { %524 = vmatpush1.bf16.msra.mxu0 %v1369_v21  ;;  %1197 = vmatpush1.bf16.msra.mxu1 %v1369_v21  ;;  %v310_v21 = vpack.c.bf16 %v272_v17, %v270_v16 }
  0x92   : > { %525 = vmatprep.subr.bf16.mxu0 %v1370_v22  ;;  %1182 = vmatprep.subr.bf16.mxu1 %v1370_v22  ;;  %v237_v22 = vld [vmem:[%s1877_s4 + $0x80] sm:$0xff] }
  0x95   : > { %526 = vmatpush1.bf16.msra.mxu0 %v1372_v23  ;;  %1198 = vmatpush1.bf16.msra.mxu1 %v1372_v23  ;;  %v239_v23 = vld [vmem:[%s1877_s4 + $0x90] sm:$0xff] }
  0x96   : > { %527 = vmatprep.subr.bf16.mxu0 %v1373_v24  ;;  %1183 = vmatprep.subr.bf16.mxu1 %v1373_v24  ;;  %v269_v24 = vld [vmem:[%s1877_s4 + $0x180] sm:$0xff] }
  0x99   : > { %528 = vmatpush1.bf16.msra.mxu0 %v1375_v25  ;;  %1199 = vmatpush1.bf16.msra.mxu1 %v1375_v25  ;;  %v271_v25 = vld [vmem:[%s1877_s4 + $0x190] sm:$0xff] }
  0x9a   : > { %529 = vmatprep.subr.bf16.mxu0 %v1376_v26  ;;  %1184 = vmatprep.subr.bf16.mxu1 %v1376_v26  ;;  %v242_v26 = vld [vmem:[%s1877_s4 + $0xa8] sm:$0xff] }
  0x9d   : > { %530 = vmatpush1.bf16.msra.mxu0 %v1378_v27  ;;  %1200 = vmatpush1.bf16.msra.mxu1 %v1378_v27  ;;  %v244_v27 = vld [vmem:[%s1877_s4 + $0xb8] sm:$0xff] }
  0x9e   : > { %531 = vmatprep.subr.bf16.mxu0 %v1379_v28  ;;  %1185 = vmatprep.subr.bf16.mxu1 %v1379_v28  ;;  %v274_v28 = vld [vmem:[%s1877_s4 + $0x1a8] sm:$0xff] }
  0xa1   : > { %532 = vmatpush1.bf16.msra.mxu0 %v1381_v29  ;;  %1201 = vmatpush1.bf16.msra.mxu1 %v1381_v29  ;;  %v276_v29 = vld [vmem:[%s1877_s4 + $0x1b8] sm:$0xff] }
  0xa2   : > { %533 = vmatprep.subr.bf16.mxu0 %v1382_v30  ;;  %1186 = vmatprep.subr.bf16.mxu1 %v1382_v30  ;;  %v293_v30 = vpack.c.bf16 %v239_v23, %v237_v22 }
  0xa5   : > { %534 = vmatpush1.bf16.msra.mxu0 %v1384_v31  ;;  %1202 = vmatpush1.bf16.msra.mxu1 %v1384_v31  ;;  %v309_v31 = vpack.c.bf16 %v271_v25, %v269_v24 }
  0xa6   : > { %535 = vmatprep.subr.bf16.mxu0 %v1385_v32  ;;  %1187 = vmatprep.subr.bf16.mxu1 %v1385_v32  ;;  %v296_v32 = vpack.c.bf16 %v244_v27, %v242_v26 }
  0xa9   : > { %536 = vmatpush1.bf16.msra.mxu0 %v1387_v33  ;;  %1203 = vmatpush1.bf16.msra.mxu1 %v1387_v33  ;;  %v312_v33 = vpack.c.bf16 %v276_v29, %v274_v28 }
  0xaa   : > { %537 = vmatprep.subr.bf16.mxu0 %v1388_v34  ;;  %1188 = vmatprep.subr.bf16.mxu1 %v1388_v34  ;;  %v241_v34 = vld [vmem:[%s1877_s4 + $0xa0] sm:$0xff] }
  0xad   : > { %538 = vmatpush1.bf16.msra.mxu0 %v1390_v35  ;;  %1204 = vmatpush1.bf16.msra.mxu1 %v1390_v35  ;;  %v243_v35 = vld [vmem:[%s1877_s4 + $0xb0] sm:$0xff] }
  0xae   : > { %539 = vmatprep.subr.bf16.mxu0 %v1391_v36  ;;  %1189 = vmatprep.subr.bf16.mxu1 %v1391_v36  ;;  %v273_v36 = vld [vmem:[%s1877_s4 + $0x1a0] sm:$0xff]  ;;  %v295_v42 = vpack.c.bf16 %v243_v35, %v241_v34 }
  0xb1   : > { %540 = vmatpush1.bf16.msra.mxu0 %v1393_v37  ;;  %1205 = vmatpush1.bf16.msra.mxu1 %v1393_v37  ;;  %v275_v37 = vld [vmem:[%s1877_s4 + $0x1b0] sm:$0xff] }
  0xb2   : > { %v311_v43 = vpack.c.bf16 %v275_v37, %v273_v36 }
  0xb4   : > { %542 = vmatmul.mubr.bf16.vlgmr.msra.gmra.mrb[0].mxu0 %v285_v46  ;;  %622 = vmatmul.mubr.bf16.vlgmr.msra.gmra.mrb[0].mxu1 %v301_v47  ;;  %v245_v46 = vld [vmem:[%s1877_s4 + $0xc0] sm:$0xff]  ;;  %v247_v47 = vld [vmem:[%s1877_s4 + $0xd0] sm:$0xff] }
  0xb5   : > { %551 = vmatprep.mubr.bf16.mxu0 %v288_v48  ;;  %631 = vmatprep.mubr.bf16.mxu1 %v304_v49  ;;  %v277_v48 = vld [vmem:[%s1877_s4 + $0x1c0] sm:$0xff]  ;;  %v279_v49 = vld [vmem:[%s1877_s4 + $0x1d0] sm:$0xff]  ;;  %v297_v54 = vpack.c.bf16 %v247_v47, %v245_v46 }
  0xb6   : > { %v313_v55 = vpack.c.bf16 %v279_v49, %v277_v48 }
  0xbc   : > { %552 = vmatmul.mubr.bf16.gmra.mrb[4].mxu0 %v287_v58  ;;  %632 = vmatmul.mubr.bf16.gmra.mrb[4].mxu1 %v303_v59  ;;  %v249_v58 = vld [vmem:[%s1877_s4 + $0xe0] sm:$0xff]  ;;  %v251_v59 = vld [vmem:[%s1877_s4 + $0xf0] sm:$0xff] }
  0xbd   : > { %561 = vmatprep.mubr.bf16.mxu0 %v290_v60  ;;  %641 = vmatprep.mubr.bf16.mxu1 %v306_v61  ;;  %v281_v60 = vld [vmem:[%s1877_s4 + $0x1e0] sm:$0xff]  ;;  %v283_v61 = vld [vmem:[%s1877_s4 + $0x1f0] sm:$0xff]  ;;  %v299_v62 = vpack.c.bf16 %v251_v59, %v249_v58  ;;  %s2025_s4 = scalar_lea.hbm %s2152_s25, %s1136_s19 }
  0xbe   : > { %v315_v63 = vpack.c.bf16 %v283_v61, %v281_v60 }
  0xc4   : > { %562 = vmatmul.mubr.bf16.gmra.mrb[8].mxu0 %v289_v6  ;;  %642 = vmatmul.mubr.bf16.gmra.mrb[8].mxu1 %v305_v7 }
  0xc5   : > { %571 = vmatprep.mubr.bf16.mxu0 %v292_v8  ;;  %651 = vmatprep.mubr.bf16.mxu1 %v308_v9 }
  0xcc   : > { %572 = vmatmul.mubr.bf16.gmra.mrb[12].mxu0 %v291_v18  ;;  %652 = vmatmul.mubr.bf16.gmra.mrb[12].mxu1 %v307_v19 }
  0xcd   : > { %581 = vmatprep.mubr.bf16.mxu0 %v294_v20  ;;  %661 = vmatprep.mubr.bf16.mxu1 %v310_v21 }
  0xd4   : > { %582 = vmatmul.mubr.bf16.gmra.mrb[16].mxu0 %v293_v30  ;;  %662 = vmatmul.mubr.bf16.gmra.mrb[16].mxu1 %v309_v31 }
  0xd5   : > { %591 = vmatprep.mubr.bf16.mxu0 %v296_v32  ;;  %671 = vmatprep.mubr.bf16.mxu1 %v312_v33 }
  0xdc   : > { %592 = vmatmul.mubr.bf16.gmra.mrb[20].mxu0 %v295_v42  ;;  %672 = vmatmul.mubr.bf16.gmra.mrb[20].mxu1 %v311_v43 }
  0xdd   : > { %601 = vmatprep.mubr.bf16.mxu0 %v298_v44  ;;  %681 = vmatprep.mubr.bf16.mxu1 %v314_v45 }
  0xe4   : > { %602 = vmatmul.mubr.bf16.gmra.mrb[24].mxu0 %v297_v54  ;;  %682 = vmatmul.mubr.bf16.gmra.mrb[24].mxu1 %v313_v55 }
  0xe5   : > { %611 = vmatprep.mubr.bf16.mxu0 %v300_v56  ;;  %691 = vmatprep.mubr.bf16.mxu1 %v316_v57 }
  0xec   : > { %612 = vmatmul.mubr.bf16.gmra.mrb[28].mxu0 %v299_v62  ;;  %692 = vmatmul.mubr.bf16.gmra.mrb[28].mxu1 %v315_v63 }
 0x187   : > { %v543_v0 = vpop.f32.mrb[0].mxu0  ;;  %v623_v1 = vpop.f32.mrb[0].mxu1 }
 0x188   : > { %v545_v2 = vpop.f32.mrb[1].mxu0  ;;  %v625_v3 = vpop.f32.mrb[1].mxu1 }
 0x189   : > { %v1142_v4 = vpack.c.bf16 %v545_v2, %v543_v0  ;;  %v1158_v5 = vpack.c.bf16 %v625_v3, %v623_v1  ;;  %v547_v6 = vpop.f32.mrb[2].mxu0  ;;  %v627_v7 = vpop.f32.mrb[2].mxu1 }
 0x18a   : > { %v549_v8 = vpop.f32.mrb[3].mxu0  ;;  %v629_v9 = vpop.f32.mrb[3].mxu1 }
 0x18b   : > { %894 = vst [vmem:[%s1989_s12] sm:$0xff] %v1142_v4  ;;  %910 = vst [vmem:[%s1989_s12 + $0x80] sm:$0xff] %v1158_v5  ;;  %v1143_v10 = vpack.c.bf16 %v549_v8, %v547_v6  ;;  %v1159_v11 = vpack.c.bf16 %v629_v9, %v627_v7 }
 0x18d   : > { %895 = vst [vmem:[%s1989_s12 + $0x8] sm:$0xff] %v1143_v10  ;;  %911 = vst [vmem:[%s1989_s12 + $0x88] sm:$0xff] %v1159_v11 }
 0x18f   : > { %v553_v12 = vpop.f32.mrb[4].mxu0  ;;  %v633_v13 = vpop.f32.mrb[4].mxu1 }
 0x190   : > { %v555_v14 = vpop.f32.mrb[5].mxu0  ;;  %v635_v15 = vpop.f32.mrb[5].mxu1 }
 0x191   : > { %v1144_v16 = vpack.c.bf16 %v555_v14, %v553_v12  ;;  %v1160_v17 = vpack.c.bf16 %v635_v15, %v633_v13  ;;  %v557_v18 = vpop.f32.mrb[6].mxu0  ;;  %v637_v19 = vpop.f32.mrb[6].mxu1 }
 0x192   : > { %v559_v20 = vpop.f32.mrb[7].mxu0  ;;  %v639_v21 = vpop.f32.mrb[7].mxu1 }
 0x193   : > { %896 = vst [vmem:[%s1989_s12 + $0x10] sm:$0xff] %v1144_v16  ;;  %912 = vst [vmem:[%s1989_s12 + $0x90] sm:$0xff] %v1160_v17  ;;  %v1145_v22 = vpack.c.bf16 %v559_v20, %v557_v18  ;;  %v1161_v23 = vpack.c.bf16 %v639_v21, %v637_v19 }
 0x195   : > { %897 = vst [vmem:[%s1989_s12 + $0x18] sm:$0xff] %v1145_v22  ;;  %913 = vst [vmem:[%s1989_s12 + $0x98] sm:$0xff] %v1161_v23 }
 0x197   : > { %v563_v24 = vpop.f32.mrb[8].mxu0  ;;  %v643_v25 = vpop.f32.mrb[8].mxu1 }
 0x198   : > { %v565_v26 = vpop.f32.mrb[9].mxu0  ;;  %v645_v27 = vpop.f32.mrb[9].mxu1 }
 0x199   : > { %v1146_v28 = vpack.c.bf16 %v565_v26, %v563_v24  ;;  %v1162_v29 = vpack.c.bf16 %v645_v27, %v643_v25  ;;  %v567_v30 = vpop.f32.mrb[10].mxu0  ;;  %v647_v31 = vpop.f32.mrb[10].mxu1 }
 0x19a   : > { %v569_v32 = vpop.f32.mrb[11].mxu0  ;;  %v649_v33 = vpop.f32.mrb[11].mxu1 }
 0x19b   : > { %898 = vst [vmem:[%s1989_s12 + $0x20] sm:$0xff] %v1146_v28  ;;  %914 = vst [vmem:[%s1989_s12 + $0xa0] sm:$0xff] %v1162_v29  ;;  %v1147_v34 = vpack.c.bf16 %v569_v32, %v567_v30  ;;  %v1163_v35 = vpack.c.bf16 %v649_v33, %v647_v31 }
 0x19d   : > { %899 = vst [vmem:[%s1989_s12 + $0x28] sm:$0xff] %v1147_v34  ;;  %915 = vst [vmem:[%s1989_s12 + $0xa8] sm:$0xff] %v1163_v35 }
 0x19f   : > { %v573_v36 = vpop.f32.mrb[12].mxu0  ;;  %v653_v37 = vpop.f32.mrb[12].mxu1 }
 0x1a0   : > { %v575_v38 = vpop.f32.mrb[13].mxu0  ;;  %v655_v39 = vpop.f32.mrb[13].mxu1 }
 0x1a1   : > { %v1148_v40 = vpack.c.bf16 %v575_v38, %v573_v36  ;;  %v1164_v41 = vpack.c.bf16 %v655_v39, %v653_v37  ;;  %v577_v42 = vpop.f32.mrb[14].mxu0  ;;  %v657_v43 = vpop.f32.mrb[14].mxu1 }
 0x1a2   : > { %v579_v44 = vpop.f32.mrb[15].mxu0  ;;  %v659_v45 = vpop.f32.mrb[15].mxu1 }
 0x1a3   : > { %900 = vst [vmem:[%s1989_s12 + $0x30] sm:$0xff] %v1148_v40  ;;  %916 = vst [vmem:[%s1989_s12 + $0xb0] sm:$0xff] %v1164_v41  ;;  %v1149_v46 = vpack.c.bf16 %v579_v44, %v577_v42  ;;  %v1165_v47 = vpack.c.bf16 %v659_v45, %v657_v43 }
 0x1a5   : > { %901 = vst [vmem:[%s1989_s12 + $0x38] sm:$0xff] %v1149_v46  ;;  %917 = vst [vmem:[%s1989_s12 + $0xb8] sm:$0xff] %v1165_v47 }
 0x1a7   : > { %v583_v48 = vpop.f32.mrb[16].mxu0  ;;  %v663_v49 = vpop.f32.mrb[16].mxu1 }
 0x1a8   : > { %v585_v50 = vpop.f32.mrb[17].mxu0  ;;  %v665_v51 = vpop.f32.mrb[17].mxu1 }
 0x1a9   : > { %v1150_v52 = vpack.c.bf16 %v585_v50, %v583_v48  ;;  %v1166_v53 = vpack.c.bf16 %v665_v51, %v663_v49  ;;  %v587_v54 = vpop.f32.mrb[18].mxu0  ;;  %v667_v55 = vpop.f32.mrb[18].mxu1 }
 0x1aa   : > { %v589_v56 = vpop.f32.mrb[19].mxu0  ;;  %v669_v57 = vpop.f32.mrb[19].mxu1 }
 0x1ab   : > { %902 = vst [vmem:[%s1989_s12 + $0x40] sm:$0xff] %v1150_v52  ;;  %918 = vst [vmem:[%s1989_s12 + $0xc0] sm:$0xff] %v1166_v53  ;;  %v1151_v58 = vpack.c.bf16 %v589_v56, %v587_v54  ;;  %v1167_v59 = vpack.c.bf16 %v669_v57, %v667_v55 }
 0x1ad   : > { %903 = vst [vmem:[%s1989_s12 + $0x48] sm:$0xff] %v1151_v58  ;;  %919 = vst [vmem:[%s1989_s12 + $0xc8] sm:$0xff] %v1167_v59 }
 0x1af   : > { %v593_v60 = vpop.f32.mrb[20].mxu0  ;;  %v673_v61 = vpop.f32.mrb[20].mxu1 }
 0x1b0   : > { %v595_v62 = vpop.f32.mrb[21].mxu0  ;;  %v675_v63 = vpop.f32.mrb[21].mxu1 }
 0x1b1   : > { %v1152_v0 = vpack.c.bf16 %v595_v62, %v593_v60  ;;  %v1168_v1 = vpack.c.bf16 %v675_v63, %v673_v61  ;;  %v597_v2 = vpop.f32.mrb[22].mxu0  ;;  %v677_v3 = vpop.f32.mrb[22].mxu1 }
 0x1b2   : > { %v599_v4 = vpop.f32.mrb[23].mxu0  ;;  %v679_v5 = vpop.f32.mrb[23].mxu1 }
 0x1b3   : > { %904 = vst [vmem:[%s1989_s12 + $0x50] sm:$0xff] %v1152_v0  ;;  %920 = vst [vmem:[%s1989_s12 + $0xd0] sm:$0xff] %v1168_v1  ;;  %v1153_v6 = vpack.c.bf16 %v599_v4, %v597_v2  ;;  %v1169_v7 = vpack.c.bf16 %v679_v5, %v677_v3 }
 0x1b5   : > { %905 = vst [vmem:[%s1989_s12 + $0x58] sm:$0xff] %v1153_v6  ;;  %921 = vst [vmem:[%s1989_s12 + $0xd8] sm:$0xff] %v1169_v7 }
 0x1b7   : > { %v603_v8 = vpop.f32.mrb[24].mxu0  ;;  %v683_v9 = vpop.f32.mrb[24].mxu1 }
 0x1b8   : > { %v605_v10 = vpop.f32.mrb[25].mxu0  ;;  %v685_v11 = vpop.f32.mrb[25].mxu1 }
 0x1b9   : > { %v1154_v12 = vpack.c.bf16 %v605_v10, %v603_v8  ;;  %v1170_v13 = vpack.c.bf16 %v685_v11, %v683_v9  ;;  %v607_v14 = vpop.f32.mrb[26].mxu0  ;;  %v687_v15 = vpop.f32.mrb[26].mxu1 }
 0x1ba   : > { %v609_v16 = vpop.f32.mrb[27].mxu0  ;;  %v689_v17 = vpop.f32.mrb[27].mxu1 }
 0x1bb   : > { %906 = vst [vmem:[%s1989_s12 + $0x60] sm:$0xff] %v1154_v12  ;;  %922 = vst [vmem:[%s1989_s12 + $0xe0] sm:$0xff] %v1170_v13  ;;  %v1155_v18 = vpack.c.bf16 %v609_v16, %v607_v14  ;;  %v1171_v19 = vpack.c.bf16 %v689_v17, %v687_v15 }
 0x1bd   : > { %907 = vst [vmem:[%s1989_s12 + $0x68] sm:$0xff] %v1155_v18  ;;  %923 = vst [vmem:[%s1989_s12 + $0xe8] sm:$0xff] %v1171_v19 }
 0x1bf   : > { %v613_v20 = vpop.f32.mrb[28].mxu0  ;;  %v693_v21 = vpop.f32.mrb[28].mxu1 }
 0x1c0   : > { %v615_v22 = vpop.f32.mrb[29].mxu0  ;;  %v695_v23 = vpop.f32.mrb[29].mxu1 }
 0x1c1   : > { %v1156_v24 = vpack.c.bf16 %v615_v22, %v613_v20  ;;  %v1172_v25 = vpack.c.bf16 %v695_v23, %v693_v21  ;;  %v617_v26 = vpop.f32.mrb[30].mxu0  ;;  %v697_v27 = vpop.f32.mrb[30].mxu1 }
 0x1c2   : > { %v619_v28 = vpop.f32.mrb[31].mxu0  ;;  %v699_v29 = vpop.f32.mrb[31].mxu1 }
 0x1c3   : > { %908 = vst [vmem:[%s1989_s12 + $0x70] sm:$0xff] %v1156_v24  ;;  %924 = vst [vmem:[%s1989_s12 + $0xf0] sm:$0xff] %v1172_v25  ;;  %v1157_v30 = vpack.c.bf16 %v619_v28, %v617_v26  ;;  %v1173_v31 = vpack.c.bf16 %v699_v29, %v697_v27 }
 0x1c5   : > { %909 = vst [vmem:[%s1989_s12 + $0x78] sm:$0xff] %v1157_v30  ;;  %925 = vst [vmem:[%s1989_s12 + $0xf8] sm:$0xff] %v1173_v31 }
 0x1c6   : > { %1467 = shalt.err (!%p1464_p11)
}
 0x1c7   : > { %s1468_s28 = scalar_lea.hbm %s2025_s4, 4096  ;;  %s1472_s5 = scalar_lea.hbm %s2152_s25, 24576 }
 0x1c8   : > { %p1469_p2 = scmp.ne.s32.totalorder %s2025_s4, %s1468_s28  ;;  %p1473_p7 = scmp.lt.u32.totalorder %s2025_s4, %s2152_s25 }
 0x1c9   : > { %p1474_p13 = scmp.lt.u32.totalorder %s1472_s5, %s1468_s28  ;;  %p1476_p1 = scmp.lt.u32.totalorder %s1468_s28, %s2025_s4 }
 0x1ca   : > { %p1470_p5 = pnand %p1469_p2, %p2153_p12 }
 0x1cb   : > { %p1475_p6 = por %p1474_p13, %p1473_p7 }
 0x1cc   : > { %p1471_p3 = pneg %p1470_p5 }
 0x1cd   : > { %p1477_p9 = por %p1476_p1, %p1475_p6 }
 0x1cf   : > { %p1478_p0 = pnand %p1477_p9, %p1471_p3 }
 0x1d1   : > { %1481 = shalt.err (!%p1478_p0)
}
 0x1d2   : > { %s1614_s19 = smov 128   ;;  %s1615_s8 = smov 384  }
 0x1d3   : > { %s1616_s23 = smov 8  }
 0x1d4   : > { %1211 = dma.vmem_to_hbm [thread:$0]  (%p2153_p12), %s2027_s18, 4096, %s2025_s4, %s2035_s26, %s1614_s19, %s1615_s8, %s1616_s23  }
 0x1d5 PF: > { %p1225_p4 = scmp.ge.s32.totalorder %s1604_s22, 2  ;;  %s958_s29 = sand.u32 1, %s1552_s9  }
 0x1d6   : > { %p2154_p10 = scmp.ne.s32.totalorder %s2145_s27, 0  ;;  %s959_s2 = scalar_lea.sflag [#allocation4], %s958_s29 }
 0x1d8   : > { %p1221_p8 = pnand %p1225_p4, %p2154_p10 }
 0x1da   : > { %1547 = dma.done.wait (!%p1221_p8), %s959_s2, 4096  }
 0x1db   : > { %1549 = vsyncadd (!%p1221_p8), %s959_s2, 4294963200  ;;  %s21_s22 = sadd.s32 1, %s1604_s22   ;;  %s2156_s18 = sld [smem:[#allocation15_spill]] }
 0x1dc   : > { %p2064_p11 = scmp.ge.s32.totalorder %s21_s22, 8   ;;  %s2157_s19 = sld [smem:[#allocation12_spill]] }
 0x1dd   : > { %s2158_s27 = sld [smem:[#allocation13_spill]]  ;;  %s2159_s21 = sld [smem:[#allocation14_spill]] }
 0x1de   : > { %s2160_s9 = smov %s1556_s10  ;;  %s2161_s10 = smov %s1560_s11 }
 0x1df   : > { %s2162_s11 = smov %s1823_s30  ;;  %s2163_s12 = smov %s1568_s13 }
 0x1e0   : > { %s2164_s13 = smov %s1572_s14  ;;  %s2166_s15 = smov %s1580_s16 }
 0x1e1   : > { %s2165_s14 = smov %s2156_s18  ;;  %s2167_s16 = smov %s1584_s17 }
 0x1e2   : > { %s2168_s17 = smov %s1820_s0  ;;  %s2169_s18 = smov %s1596_s20 }
 0x1e3   : > { %s2170_s20 = smov %s2158_s27  ;;  %20 = sbr.rel (!%p2064_p11) target bundleno = 15 (0xf), region = 86 }
 0x1ea   :  { %964 = vsyncpa [#allocation3], 1 }
 0x1eb   :  { %966 = vsyncpa [#allocation3 + $0x1], 1 }
 0x1ec   :  { %967 = vsyncpa [#allocation6], 1 }
 0x1ed   :  { %969 = vsyncpa [#allocation6 + $0x1], 1 }
 0x1ee   :  { %970 = vsyncpa [#allocation4], 1 }
 0x1ef   :  { %972 = vsyncpa [#allocation4 + $0x1], 1 }

</bundles_post_ra>
